<compile_context>
chip_gen: v6e
topology: v6e:2x2x1
jax: 0.10.0
libtpu: 0.0.40
codegen_flags: <defaults>
</compile_context>

<pallas_src>
import functools
import math

import jax
import jax.numpy as jnp
from jax.experimental import pallas as pl
from jax.experimental.pallas import tpu as pltpu

# StateSE2Index: X=0, Y=1, HEADING=2, size()=3
SE2_SIZE = 3
SE2_HEADING = 2
LANE = 128
SUBLANE = 8


def _round_up(x: int, m: int) -> int:
    return pl.cdiv(x, m) * m


def _vmem_limits():
    """(budget_bytes, vmem_limit_bytes) derived from the actual chip."""
    cap = 64 << 20  # conservative default: v7x per-TensorCore VMEM
    try:
        info = pltpu.get_tpu_info()
        cap = int(getattr(info, "vmem_capacity_bytes", cap)) or cap
    except Exception:
        pass
    limit = min(int(cap * 0.85), 100 << 20)
    budget = int(limit * 0.8)
    return budget, limit


# ---------------------------------------------------------------------------
# Kernel
# ---------------------------------------------------------------------------
def _traj_head_kernel(x_ref, w1_ref, b1_ref, w2_ref, b2_ref, o_ref, acc_ref):
    k = pl.program_id(1)

    @pl.when(k == 0)
    def _():
        acc_ref[...] = jnp.zeros_like(acc_ref)

    # Linear1 + ReLU: bf16 MXU, f32 accumulate, bias added in f32.
    x = x_ref[...].astype(w1_ref.dtype)
    h = jnp.dot(x, w1_ref[...], preferred_element_type=jnp.float32) + b1_ref[...]
    h = jnp.maximum(h, 0.0)

    # Linear2 partial sum over this d_ffn (K) tile.
    acc_ref[...] += jnp.dot(h.astype(w2_ref.dtype), w2_ref[...],
                            preferred_element_type=jnp.float32)

    @pl.when(k == pl.num_programs(1) - 1)
    def _():
        y = acc_ref[...] + b2_ref[...]
        # Heading channel sits at lane % 3 == 2 in the natural interleaved
        # layout; padded lanes are exactly zero so the transform is a no-op
        # there.  One full-width (unmasked) store.
        lane = jax.lax.broadcasted_iota(jnp.int32, y.shape, dimension=1)
        y = jnp.where(lane % 3 == 2, jnp.tanh(y) * jnp.float32(math.pi), y)
        o_ref[...] = y.astype(o_ref.dtype)


# ---------------------------------------------------------------------------
# One-time weight preparation (hoisted out of the per-call path)
# ---------------------------------------------------------------------------
def prepare_params(w1, b1, w2, b2, num_poses, compute_dtype=jnp.bfloat16):
    """Weights stored (in_features, out_features), i.e. transposed vs PyTorch."""
    d_model, d_ffn = w1.shape
    out_dim = num_poses * SE2_SIZE
    assert w2.shape == (d_ffn, out_dim)
    assert b1.shape == (d_ffn,) and b2.shape == (out_dim,)

    out_p = _round_up(out_dim, LANE)
    budget, limit = _vmem_limits()
    wsz = jnp.dtype(compute_dtype).itemsize

    # Resident-weight footprint at K-tile size tk.  Factor 2: Pallas allocates
    # two pipeline buffers per input even for constant-index weight blocks.
    def weight_bytes(tk):
        return 2 * ((d_model * tk + tk * out_p) * wsz + (tk + out_p) * 4)

    if weight_bytes(d_ffn) <= budget // 2:
        tk = dffn_p = d_ffn                 # fully resident weights, no K-tiling
    else:
        tk = LANE
        while tk + LANE <= _round_up(d_ffn, LANE) and \
                weight_bytes(tk + LANE) <= budget // 2:
            tk += LANE
        dffn_p = _round_up(d_ffn, tk)       # zero-pad: partial K-tiles are exact

    f32 = jnp.float32
    w1_p = jnp.zeros((d_model, dffn_p), compute_dtype).at[:, :d_ffn].set(
        w1.astype(compute_dtype))
    b1_p = jnp.zeros((1, dffn_p), f32).at[0, :d_ffn].set(b1.astype(f32))
    w2_p = jnp.zeros((dffn_p, out_p), compute_dtype).at[:d_ffn, :out_dim].set(
        w2.astype(compute_dtype))
    b2_p = jnp.zeros((1, out_p), f32).at[0, :out_dim].set(b2.astype(f32))

    return dict(
        w1=w1_p, b1=b1_p, w2=w2_p, b2=b2_p,
        num_poses=num_poses, d_model=d_model, out_dim=out_dim, out_p=out_p,
        tk=tk, dffn_p=dffn_p, budget=budget, vmem_limit=limit,
        weight_bytes=weight_bytes(tk),
    )


def _pick_batch_tile(B, d_model, tk, out_p, budget_left, tb_max=1024):
    tb_cap = tb_max
    if B >= 2 * SUBLANE:
        # Keep >= 2 batch tiles so the "parallel" axis can feed both v7x cores.
        tb_cap = min(tb_cap, _round_up(pl.cdiv(B, 2), SUBLANE))
    tb = min(_round_up(B, SUBLANE), tb_cap)
    tb = max(SUBLANE, (tb // SUBLANE) * SUBLANE)
    # VMEM per batch row: double-buffered x + out tiles, f32 accumulator,
    # plus slack for the in-kernel hidden / bf16 intermediates.
    per_row = (2 * d_model + 3 * out_p) * 4 + tk * 8 + 2 * d_model
    while tb > SUBLANE and tb * per_row > budget_left:
        tb -= SUBLANE
    return max(tb, SUBLANE)


# ---------------------------------------------------------------------------
# Forward
# ---------------------------------------------------------------------------
def trajectory_head_forward(object_queries, params):
    """object_queries: (B, d_model) -> {'trajectory': (B, num_poses, 3)}."""
    B, d_model = object_queries.shape
    assert d_model == params["d_model"]
    out_p, tk, dffn_p = params["out_p"], params["tk"], params["dffn_p"]
    num_poses, out_dim = params["num_poses"], params["out_dim"]
    dtype = object_queries.dtype

    budget_left = max(params["budget"] - params["weight_bytes"], 1 << 20)
    tb = _pick_batch_tile(B, d_model, tk, out_p, budget_left)
    nb = pl.cdiv(B, tb)          # partial last batch tile is masked on writeback
    nk = dffn_p // tk

    flat = pl.pallas_call(
        _traj_head_kernel,
        out_shape=jax.ShapeDtypeStruct((B, out_p), dtype),
        grid_spec=pltpu.PrefetchScalarGridSpec(
            num_scalar_prefetch=0,
            grid=(nb, nk),
            in_specs=[
                pl.BlockSpec((tb, d_model), lambda i, k: (i, 0)),   # x, unpadded
                pl.BlockSpec((d_model, tk), lambda i, k: (0, k)),   # w1 (bf16)
                pl.BlockSpec((1, tk), lambda i, k: (0, k)),         # b1 (f32)
                pl.BlockSpec((tk, out_p), lambda i, k: (k, 0)),     # w2 (bf16)
                pl.BlockSpec((1, out_p), lambda i, k: (0, 0)),      # b2 (f32)
            ],
            out_specs=pl.BlockSpec((tb, out_p), lambda i, k: (i, 0)),
            scratch_shapes=[pltpu.VMEM((tb, out_p), jnp.float32)],
        ),
        compiler_params=pltpu.CompilerParams(
            dimension_semantics=("parallel", "arbitrary"),
            vmem_limit_bytes=int(params["vmem_limit"]),
        ),
    )(object_queries, params["w1"], params["b1"], params["w2"], params["b2"])

    traj = flat[:, :out_dim].reshape(B, num_poses, SE2_SIZE)
    return {"trajectory": traj}


def _init_params(key, d_model, d_ffn, num_poses):
    """Deterministic synthetic init mirroring nn.Linear shapes (stored transposed)."""
    out_dim = num_poses * SE2_SIZE
    k1, k2, k3, k4 = jax.random.split(key, 4)
    s1 = 1.0 / math.sqrt(d_model)
    s2 = 1.0 / math.sqrt(d_ffn)
    w1 = jax.random.uniform(k1, (d_model, d_ffn), jnp.float32, -s1, s1)
    b1 = jax.random.uniform(k2, (d_ffn,), jnp.float32, -s1, s1)
    w2 = jax.random.uniform(k3, (d_ffn, out_dim), jnp.float32, -s2, s2)
    b2 = jax.random.uniform(k4, (out_dim,), jnp.float32, -s2, s2)
    return w1, b1, w2, b2


if __name__ == "__main__":
    B, d_model, d_ffn, num_poses = 8, 32, 64, 8

    key = jax.random.PRNGKey(0)
    kx, kp = jax.random.split(key)
    object_queries = jax.random.normal(kx, (B, d_model), jnp.float32)
    w1, b1, w2, b2 = _init_params(kp, d_model, d_ffn, num_poses)

    params = prepare_params(w1, b1, w2, b2, num_poses)   # one-time, hoisted
    out = trajectory_head_forward(object_queries, params)
    traj = jax.block_until_ready(out["trajectory"])

    # Reference in plain JAX f32 (same math as the PyTorch module).
    h_ref = jnp.maximum(object_queries @ w1 + b1, 0.0)
    y_ref = (h_ref @ w2 + b2).reshape(B, num_poses, SE2_SIZE)
    y_ref = y_ref.at[..., SE2_HEADING].set(jnp.tanh(y_ref[..., SE2_HEADING]) * math.pi)

    assert traj.shape == (B, num_poses, SE2_SIZE)
    # bf16-in / f32-accumulate matmuls -> parity tolerance loosened vs f32 ref.
    max_err = float(jnp.max(jnp.abs(traj - y_ref)))
    assert jnp.allclose(traj, y_ref, atol=5e-2, rtol=5e-2), max_err

    print("KERNEL_OK")
</pallas_src>

<mosaic_0001>
module attributes {stable_mosaic.version = 11 : i64} {
  func.func @_traj_head_kernel(%arg0: i32, %arg1: i32, %arg2: memref<8x32xf32, #tpu.memory_space<vmem>>, %arg3: memref<32x64xbf16, #tpu.memory_space<vmem>>, %arg4: memref<1x64xf32, #tpu.memory_space<vmem>>, %arg5: memref<64x128xbf16, #tpu.memory_space<vmem>>, %arg6: memref<1x128xf32, #tpu.memory_space<vmem>>, %arg7: memref<8x128xf32, #tpu.memory_space<vmem>>, %arg8: memref<8x128xf32, #tpu.memory_space<vmem>>) attributes {dimension_semantics = [#tpu.dimension_semantics<parallel>, #tpu.dimension_semantics<arbitrary>], iteration_bounds = array<i64: 1, 1>, scalar_prefetch = 0 : i64, scratch_operands = 1 : i64, tpu.core_type = #tpu.core_type<tc>, window_params = [{transform_indices = @transform_0, window_bounds = array<i64: 8, 32>}, {transform_indices = @transform_1, window_bounds = array<i64: 32, 64>}, {transform_indices = @transform_2, window_bounds = array<i64: 1, 64>}, {transform_indices = @transform_3, window_bounds = array<i64: 64, 128>}, {pipeline_mode = #tpu.pipeline_mode<synchronous>, transform_indices = @transform_4, window_bounds = array<i64: 1, 128>}, {transform_indices = @transform_5, window_bounds = array<i64: 8, 128>}]} {
    %c0_i32 = arith.constant 0 : i32
    %0 = arith.cmpi eq, %arg1, %c0_i32 : i32
    %1 = arith.extui %0 : i1 to i32
    %c0_i32_0 = arith.constant 0 : i32
    %2 = arith.cmpi ne, %1, %c0_i32_0 : i32
    scf.if %2 {
      %cst_16 = arith.constant 0.000000e+00 : f32
      %21 = vector.broadcast %cst_16 : f32 to vector<8x128xf32>
      %c0_17 = arith.constant 0 : index
      %c0_18 = arith.constant 0 : index
      %22 = vector.load %arg8[%c0_17, %c0_18] : memref<8x128xf32, #tpu.memory_space<vmem>>, vector<8x128xf32>
      tpu.vector_store %arg8[%c0_17, %c0_18], %21 {strides = array<i32>} : memref<8x128xf32, #tpu.memory_space<vmem>>, vector<8x128xf32>,
    } else {
    }
    %c0 = arith.constant 0 : index
    %c0_1 = arith.constant 0 : index
    %3 = vector.load %arg2[%c0, %c0_1] : memref<8x32xf32, #tpu.memory_space<vmem>>, vector<8x32xf32>
    %4 = arith.truncf %3 : vector<8x32xf32> to vector<8x32xbf16>
    %c0_2 = arith.constant 0 : index
    %c0_3 = arith.constant 0 : index
    %5 = vector.load %arg3[%c0_2, %c0_3] : memref<32x64xbf16, #tpu.memory_space<vmem>>, vector<32x64xbf16>
    %cst = arith.constant dense<0.000000e+00> : vector<8x64xf32>
    %6 = tpu.matmul %4, %5, %cst {dimension_numbers = #tpu.dot_dimension_numbers<[1], [0], [0], [1], [0, 0, 1, 1], [], []>} : vector<8x32xbf16>, vector<32x64xbf16>, vector<8x64xf32> -> vector<8x64xf32>
    %c0_4 = arith.constant 0 : index
    %c0_5 = arith.constant 0 : index
    %7 = vector.load %arg4[%c0_4, %c0_5] : memref<1x64xf32, #tpu.memory_space<vmem>>, vector<1x64xf32>
    %8 = vector.broadcast %7 : vector<1x64xf32> to vector<8x64xf32>
    %9 = arith.addf %6, %8 : vector<8x64xf32>
    %cst_6 = arith.constant 0.000000e+00 : f32
    %10 = vector.broadcast %cst_6 : f32 to vector<8x64xf32>
    %11 = arith.maximumf %9, %10 : vector<8x64xf32>
    %c0_7 = arith.constant 0 : index
    %c0_8 = arith.constant 0 : index
    %12 = vector.load %arg8[%c0_7, %c0_8] : memref<8x128xf32, #tpu.memory_space<vmem>>, vector<8x128xf32>
    %13 = arith.truncf %11 : vector<8x64xf32> to vector<8x64xbf16>
    %c0_9 = arith.constant 0 : index
    %c0_10 = arith.constant 0 : index
    %14 = vector.load %arg5[%c0_9, %c0_10] : memref<64x128xbf16, #tpu.memory_space<vmem>>, vector<64x128xbf16>
    %cst_11 = arith.constant dense<0.000000e+00> : vector<8x128xf32>
    %15 = tpu.matmul %13, %14, %cst_11 {dimension_numbers = #tpu.dot_dimension_numbers<[1], [0], [0], [1], [0, 0, 1, 1], [], []>} : vector<8x64xbf16>, vector<64x128xbf16>, vector<8x128xf32> -> vector<8x128xf32>
    %16 = arith.addf %12, %15 : vector<8x128xf32>
    %c0_12 = arith.constant 0 : index
    %c0_13 = arith.constant 0 : index
    %17 = vector.load %arg8[%c0_12, %c0_13] : memref<8x128xf32, #tpu.memory_space<vmem>>, vector<8x128xf32>
    tpu.vector_store %arg8[%c0_12, %c0_13], %16 {strides = array<i32>} : memref<8x128xf32, #tpu.memory_space<vmem>>, vector<8x128xf32>,
    %c0_i32_14 = arith.constant 0 : i32
    %18 = arith.cmpi eq, %arg1, %c0_i32_14 : i32
    %19 = arith.extui %18 : i1 to i32
    %c0_i32_15 = arith.constant 0 : i32
    %20 = arith.cmpi ne, %19, %c0_i32_15 : i32
    scf.if %20 {
      %c0_16 = arith.constant 0 : index
      %c0_17 = arith.constant 0 : index
      %21 = vector.load %arg8[%c0_16, %c0_17] : memref<8x128xf32, #tpu.memory_space<vmem>>, vector<8x128xf32>
      %c0_18 = arith.constant 0 : index
      %c0_19 = arith.constant 0 : index
      %22 = vector.load %arg6[%c0_18, %c0_19] : memref<1x128xf32, #tpu.memory_space<vmem>>, vector<1x128xf32>
      %23 = vector.broadcast %22 : vector<1x128xf32> to vector<8x128xf32>
      %24 = arith.addf %21, %23 : vector<8x128xf32>
      %25 = tpu.iota {dimensions = array<i32: 1>} : vector<8x128xi32>
      %c3_i32 = arith.constant 3 : i32
      %c0_i32_20 = arith.constant 0 : i32
      %26 = arith.cmpi eq, %c3_i32, %c0_i32_20 : i32
      %c1_i32 = arith.constant 1 : i32
      %27 = arith.select %26, %c1_i32, %c3_i32 : i32
      %28 = vector.broadcast %27 : i32 to vector<8x128xi32>
      %29 = arith.remsi %25, %28 : vector<8x128xi32>
      %c0_i32_21 = arith.constant 0 : i32
      %30 = vector.broadcast %c0_i32_21 : i32 to vector<8x128xi32>
      %31 = arith.cmpi ne, %29, %30 : vector<8x128xi32>
      %c0_i32_22 = arith.constant 0 : i32
      %32 = vector.broadcast %c0_i32_22 : i32 to vector<8x128xi32>
      %33 = arith.cmpi slt, %29, %32 : vector<8x128xi32>
      %c0_i32_23 = arith.constant 0 : i32
      %34 = arith.cmpi slt, %27, %c0_i32_23 : i32
      %35 = vector.broadcast %34 : i1 to vector<8x128xi1>
      %36 = vector.broadcast %35 : vector<8x128xi1> to vector<8x128xi1>
      %37 = arith.xori %33, %36 : vector<8x128xi1>
      %38 = arith.andi %37, %31 : vector<8x128xi1>
      %39 = vector.broadcast %27 : i32 to vector<8x128xi32>
      %40 = arith.addi %29, %39 : vector<8x128xi32>
      %41 = arith.select %38, %40, %29 : vector<8x128xi1>, vector<8x128xi32>
      %c2_i32 = arith.constant 2 : i32
      %42 = vector.broadcast %c2_i32 : i32 to vector<8x128xi32>
      %43 = arith.cmpi eq, %41, %42 : vector<8x128xi32>
      %44 = math.tanh %24 : vector<8x128xf32>
      %cst_24 = arith.constant 3.14159274 : f32
      %45 = vector.broadcast %cst_24 : f32 to vector<8x128xf32>
      %46 = arith.mulf %44, %45 : vector<8x128xf32>
      %47 = arith.select %43, %46, %24 : vector<8x128xi1>, vector<8x128xf32>
      %c0_25 = arith.constant 0 : index
      %c0_26 = arith.constant 0 : index
      %48 = vector.load %arg7[%c0_25, %c0_26] : memref<8x128xf32, #tpu.memory_space<vmem>>, vector<8x128xf32>
      tpu.vector_store %arg7[%c0_25, %c0_26], %47 {strides = array<i32>} : memref<8x128xf32, #tpu.memory_space<vmem>>, vector<8x128xf32>,
    } else {
    }
    return
  }
  func.func @transform_0(%arg0: i32, %arg1: i32) -> (i32, i32) {
    %c0_i32 = arith.constant 0 : i32
    %c0_i32_0 = arith.constant 0 : i32
    return %arg0, %c0_i32 : i32, i32
  }
  func.func @transform_1(%arg0: i32, %arg1: i32) -> (i32, i32) {
    %c0_i32 = arith.constant 0 : i32
    %c0_i32_0 = arith.constant 0 : i32
    return %c0_i32, %arg1 : i32, i32
  }
  func.func @transform_2(%arg0: i32, %arg1: i32) -> (i32, i32) {
    %c0_i32 = arith.constant 0 : i32
    %c0_i32_0 = arith.constant 0 : i32
    return %c0_i32, %arg1 : i32, i32
  }
  func.func @transform_3(%arg0: i32, %arg1: i32) -> (i32, i32) {
    %c0_i32 = arith.constant 0 : i32
    %c0_i32_0 = arith.constant 0 : i32
    return %arg1, %c0_i32 : i32, i32
  }
  func.func @transform_4(%arg0: i32, %arg1: i32) -> (i32, i32) {
    %c0_i32 = arith.constant 0 : i32
    %c0_i32_0 = arith.constant 0 : i32
    %c0_i32_1 = arith.constant 0 : i32
    return %c0_i32, %c0_i32_0 : i32, i32
  }
  func.func @transform_5(%arg0: i32, %arg1: i32) -> (i32, i32) {
    %c0_i32 = arith.constant 0 : i32
    %c0_i32_0 = arith.constant 0 : i32
    return %arg0, %c0_i32 : i32, i32
  }
}

</mosaic_0001>

<bundles_post_ra>
// kernel: tpu_custom_call.1
= control target key start
LH: loop header
LB: loop body
LE: loop exit
PB: predicated region body
PF: predicated region fallthrough
CT: control target
= control target key end

     0   :  { %10 = vsyncpa [#allocation4], 0  ;;  %s469_s0 = inlined_call_operand.hbm [shape: f32[8,32], index: 0, kind: input, shape index: {}]   ;;  %s470_s1 = inlined_call_operand.hbm [shape: bf16[32,64], index: 1, kind: input, shape index: {}]   ;;  %s471_s2 = inlined_call_operand.vmem [shape: f32[1,64], index: 2, kind: input, shape index: {}]   ;;  %s472_s3 = inlined_call_operand.hbm [shape: bf16[64,128], index: 3, kind: input, shape index: {}]   ;;  %s473_s4 = inlined_call_operand.vmem [shape: f32[1,128], index: 4, kind: input, shape index: {}]   ;;  %s474_s5 = inlined_call_operand.hbm [shape: f32[8,128], index: 5, kind: output, shape index: {}]  }
   0x1   :  { %11 = vsyncpa [#allocation7], 0 }
   0x2   :  { %12 = vsyncpa [#allocation5], 0  ;;  %s409_s18 = smov [#allocation6]  }
   0x3   :  { %s28_s19 = sshll.u32 %s409_s18, 4  ;;  %s29_s19 = int_to_ptr.vmem [resolvable:$true] %s28_s19 }
   0x4   :  { %s331_s20 = scalar_lea.vmem %s29_s19, 256  ;;  %p336_p1 = scmp.lt.s32.totalorder %s29_s19, %s29_s19 }
   0x5   :  { %p332_p0 = scmp.ne.s32.totalorder %s29_s19, %s331_s20  ;;  %p337_p2 = scmp.lt.s32.totalorder %s331_s20, %s331_s20 }
   0x7   :  { %p338_p3 = por %p337_p2, %p336_p1 }
   0x9   :  { %p339_p4 = pnand %p338_p3, %p332_p0 }
   0xb   :  { %342 = shalt.err (!%p339_p4)
}
   0xc   :  { %s410_s21 = smov 64   ;;  %s411_s22 = smov 4  }
   0xd   :  { %34 = dma.hbm_to_vmem [thread:$0]  %s470_s1, 256, %s29_s19, [#allocation7], %s410_s21, %s410_s21, %s411_s22  }
   0xe   :  { %s412_s25 = smov [#allocation3]   ;;  %s413_s27 = smov [#allocation8]  }
   0xf   :  { %s19_s26 = sshll.u32 %s412_s25, 4  ;;  %s42_s28 = sshll.u32 %s413_s27, 4  ;;  %s20_s26 = int_to_ptr.vmem [resolvable:$true] %s19_s26  ;;  %s43_s28 = int_to_ptr.vmem [resolvable:$true] %s42_s28 }
  0x10   :  { %s351_s29 = scalar_lea.vmem %s20_s26, 128  ;;  %p356_p6 = scmp.lt.s32.totalorder %s20_s26, %s20_s26 }
  0x11   :  { %p352_p5 = scmp.ne.s32.totalorder %s20_s26, %s351_s29  ;;  %p357_p7 = scmp.lt.s32.totalorder %s351_s29, %s351_s29 }
  0x13   :  { %p358_p8 = por %p357_p7, %p356_p6 }
  0x15   :  { %p359_p9 = pnand %p358_p8, %p352_p5 }
  0x17   :  { %362 = shalt.err (!%p359_p9)
}
  0x18   :  { %22 = dma.hbm_to_vmem [thread:$0]  %s469_s0, 128, %s20_s26, [#allocation4]  }
  0x19   :  { %s371_s7 = scalar_lea.vmem %s43_s28, 512  ;;  %p376_p11 = scmp.lt.s32.totalorder %s43_s28, %s43_s28 }
  0x1a   :  { %p372_p10 = scmp.ne.s32.totalorder %s43_s28, %s371_s7  ;;  %p377_p12 = scmp.lt.s32.totalorder %s371_s7, %s371_s7 }
  0x1c   :  { %p378_p13 = por %p377_p12, %p376_p11 }
  0x1e   :  { %p379_p0 = pnand %p378_p13, %p372_p10 }
  0x20   :  { %382 = shalt.err (!%p379_p0)
}
  0x21   :  { %48 = dma.hbm_to_vmem [thread:$0]  %s472_s3, 512, %s43_s28, [#allocation7], %s410_s21, %s410_s21, %s411_s22  }
  0x22   :  { %403 = dma.done.wait [#allocation4], 128  }
  0x23   :  { %404 = vsyncadd [#allocation4], 4294967168 }
  0x24   :  { %405 = dma.done.wait [#allocation7], 768  }
  0x25   :  { %406 = vsyncadd [#allocation7], 4294966528  ;;  %v414_v0 = vmov 0.0   ;;  %vm415_vm0 = vmmov 0   ;;  %v315_v1 = vld [vmem:[#allocation6 + $0x8] sm:$0xff]   ;;  %v316_v2 = vld [vmem:[#allocation6] sm:$0xff]   ;;  %v228_v17 = vlaneseq }
  0x26   :  { %285 = vmatprep.subr.bf16.mxu0 %v414_v0  ;;  %289 = vmatprep.mubr.msk.bf16.mxu0 %vm415_vm0, %v414_v0  ;;  %v66_v3 = vld [vmem:[#allocation3] sm:$0xff]  ;;  %v317_v4 = vld [vmem:[#allocation8 + $0x18] sm:$0xff]   ;;  %v318_v5 = vld [vmem:[#allocation8 + $0x10] sm:$0xff]   ;;  %vm91_vm1 = vcmask 261120   ;;  %vm170_vm2 = vcmask 523264  }
  0x27   :  { %293 = vmatprep.subr.bf16.mxu1 %v414_v0  ;;  %301 = vmatprep.mubr.msk.bf16.mxu1 %vm415_vm0, %v414_v0  ;;  %v67_v6 = vpack.c.bf16 %v66_v3, %v66_v3  ;;  %v319_v7 = vld [vmem:[#allocation8 + $0x8] sm:$0xff]   ;;  %v320_v8 = vld [vmem:[#allocation8] sm:$0xff]   ;;  %v229_v18 = vand.u32 127, %v228_v17 }
  0x28   :  { %286 = vmatpush3.bf16.msra.mxu0 %v315_v1  ;;  %294 = vmatpush3.bf16.msra.mxu1 %v317_v4  ;;  %v267_v9 = vld [vmem:[%s471_s2] ss:$0 sm:$0xff]  ;;  %s416_s2 = smov [#allocation9]  }
  0x29   :  { %287 = vmatprep.subr.bf16.mxu0 %v414_v0  ;;  %295 = vmatprep.subr.bf16.mxu1 %v414_v0  ;;  %v459_v19 = vmul.u32.u64.low 2863311531, %v229_v18  ;;  %v460_v20 = vmul.u32.u64.high 2863311531, %v229_v18, %v459_v19  ;;  %v276_v22 = vld [vmem:[%s473_s4] ss:$0 sm:$0xff]  ;;  %s257_s11 = sshll.u32 %s416_s2, 4  ;;  %s258_s11 = int_to_ptr.vmem [resolvable:$true] %s257_s11 }
  0x2a   :  { %s383_s4 = scalar_lea.vmem %s258_s11, 128  ;;  %p388_p2 = scmp.lt.s32.totalorder %s258_s11, %s258_s11 }
  0x2b   :  { %v236_v21 = vshrl.u32 %v460_v20, 1  ;;  %p384_p1 = scmp.ne.s32.totalorder %s258_s11, %s383_s4  ;;  %p389_p3 = scmp.lt.s32.totalorder %s383_s4, %s383_s4 }
  0x2c   :  { %288 = vmatpush3.bf16.msra.mxu0 %v316_v2  ;;  %296 = vmatpush3.bf16.msra.mxu1 %v318_v5 }
  0x2d   :  { %297 = vmatprep.subr.bf16.mxu1 %v414_v0  ;;  %v237_v23 = vmul.u32 3, %v236_v21  ;;  %p390_p4 = por %p389_p3, %p388_p2 }
  0x2f   :  { %290 = vmatmul.mubr.msk.bf16.vlgmr.msra.gmra.mxu0 %vm91_vm1, %v67_v6  ;;  %v238_v27 = vsub.s32 %v229_v18, %v237_v23  ;;  %p391_p5 = pnand %p390_p4, %p384_p1 }
  0x30   :  { %298 = vmatpush3.bf16.msra.mxu1 %v319_v7 }
  0x31   :  { %299 = vmatprep.subr.bf16.mxu1 %v414_v0  ;;  %vm241_vm3 = vcmp.ne.s32.totalorder %v238_v27, 0  ;;  %vm242_vm4 = vcmp.lt.s32.totalorder %v238_v27, 0  ;;  %v244_v30 = vadd.s32 3, %v238_v27 }
  0x32   :  { %vm243_vm5 = vmand %vm242_vm4, %vm241_vm3 }
  0x33   :  { %v245_v31 = vsel %vm243_vm5, %v244_v30, %v238_v27 }
  0x34   :  { %300 = vmatpush3.bf16.msra.mxu1 %v320_v8  ;;  %vm246_vm6 = vcmp.eq.s32.totalorder %v245_v31, 2 }
  0xef   :  { %v129_v10 = vpop.f32.mrf.mxu0 }
  0xf0   :  { %v130_v11 = vadd.f32 %v267_v9, %v129_v10 }
  0xf1   :  { %v291_v12 = vpop.f32.mrf.mxu0 }
  0xf2   :  { %v135_v13 = vmax.f32 %v130_v11, 0.0 }
  0xf3   :  { %v132_v14 = vpop.f32.mrf.mxu0 }
  0xf4   :  { %v137_v15 = vpack.c.bf16 %v135_v13, %v135_v13 }
  0xf5   :  { %v292_v16 = vpop.f32.mrf.mxu0 }
  0xf6   :  { %302 = vmatmul.mubr.msk.bf16.vlgmr.msra.gmra.mxu1 %vm170_vm2, %v137_v15 }
 0x1b6   :  { %v208_v24 = vpop.f32.mrf.mxu1 }
 0x1b7   :  { %v227_v25 = vadd.f32 %v276_v22, %v208_v24 }
 0x1b8   :  { %v303_v26 = vpop.f32.mrf.mxu1 }
 0x1b9   :  { %321 = vtanh.f32 %v227_v25 }
 0x1ba   :  { %v211_v28 = vpop.f32.mrf.mxu1 }
 0x1bc   :  { %v304_v29 = vpop.f32.mrf.mxu1 }
 0x1c6   :  { %v322_v32 = vpop.eup %321 }
 0x1c7   :  { %v248_v33 = vmul.f32 3.1415927, %v322_v32 }
 0x1c9   :  { %v249_v34 = vsel %vm246_vm6, %v248_v33, %v227_v25 }
 0x1ca   :  { %250 = vst [vmem:[#allocation9] sm:$0xff] %v249_v34 }
 0x1cb   :  { %394 = shalt.err (!%p391_p5)
}
 0x1cc   :  { %260 = dma.vmem_to_hbm [thread:$0]  %s258_s11, 128, %s474_s5, [#allocation5]  }
 0x1cd   :  { %407 = dma.done.wait [#allocation5], 128  }
 0x1ce   :  { %408 = vsyncadd [#allocation5], 4294967168 }
 0x1cf   :  { %264 = vsyncpa [#allocation4], 1 }
 0x1d0   :  { %265 = vsyncpa [#allocation7], 1 }
 0x1d1   :  { %266 = vsyncpa [#allocation5], 1 }

</bundles_post_ra>
